<compile_context>
chip_gen: v6e
topology: v6e:2x2x1
jax: 0.10.0
libtpu: 0.0.40
codegen_flags: <defaults>
</compile_context>

<pallas_src>
import jax
import jax.numpy as jnp
from jax.experimental import pallas as pl
from jax.experimental.pallas import tpu as pltpu


def _matmul_relu_kernel(x_ref, w_ref, o_ref):
    # x_ref: (1, K) f32   — flattened activation
    # w_ref: (K, N) f32   — un-transposed weight
    # o_ref: (1, N) f32
    y = jnp.dot(x_ref[...], w_ref[...], preferred_element_type=jnp.float32)
    o_ref[...] = jnp.maximum(y, 0.0).astype(o_ref.dtype)


def matmul_relu(x2d, w):
    """relu(x2d @ w): x2d (1, K) f32, w (K, N) f32 -> (1, N) f32."""
    M, K = x2d.shape
    K2, N = w.shape
    assert K == K2 and M == 1

    return pl.pallas_call(
        _matmul_relu_kernel,
        out_shape=jax.ShapeDtypeStruct((M, N), jnp.float32),
        # Whole arrays resident in VMEM, single invocation (no grid).
        in_specs=[
            pl.BlockSpec(memory_space=pltpu.MemorySpace.VMEM),
            pl.BlockSpec(memory_space=pltpu.MemorySpace.VMEM),
        ],
        out_specs=pl.BlockSpec(memory_space=pltpu.MemorySpace.VMEM),
    )(x2d, w)


@jax.jit
def model_forward(x1, w1):
    K, N = w1.shape
    # torch .view((1, -1)) == row-major flatten (zero-copy view / XLA bitcast).
    x_flat = x1.reshape(1, -1)
    assert x_flat.shape[1] == K
    return matmul_relu(x_flat, w1)          # (1, N), matches torch output layout


if __name__ == "__main__":
    key = jax.random.PRNGKey(0)
    kx, kw = jax.random.split(key)

    # Small shapes consistent with the module: flatten(1,3,32,32) -> K = 3072,
    # matching w1 of shape (3072, 8).
    x1 = jax.random.normal(kx, (1, 3, 32, 32), dtype=jnp.float32)   # ~ torch.randn
    w1 = jax.random.uniform(kw, (3072, 8), dtype=jnp.float32)       # ~ torch.rand

    out = jax.block_until_ready(model_forward(x1, w1))

    # Reference check in plain JAX.
    ref = jnp.maximum(x1.reshape(1, -1) @ w1, 0.0)
    assert out.shape == (1, 8) and out.dtype == jnp.float32
    assert jnp.allclose(out, ref, rtol=1e-5, atol=1e-5)

    print("KERNEL_OK")
</pallas_src>

<mosaic_0001>
module attributes {stable_mosaic.version = 11 : i64} {
  func.func @_matmul_relu_kernel(%arg0: memref<1x3072xf32, #tpu.memory_space<vmem>>, %arg1: memref<3072x8xf32, #tpu.memory_space<vmem>>, %arg2: memref<1x8xf32, #tpu.memory_space<vmem>>) attributes {dimension_semantics = [], scalar_prefetch = 0 : i64, scratch_operands = 0 : i64, tpu.core_type = #tpu.core_type<tc>} {
    %c0 = arith.constant 0 : index
    %c0_0 = arith.constant 0 : index
    %0 = vector.load %arg0[%c0, %c0_0] : memref<1x3072xf32, #tpu.memory_space<vmem>>, vector<1x3072xf32>
    %c0_1 = arith.constant 0 : index
    %c0_2 = arith.constant 0 : index
    %1 = vector.load %arg1[%c0_1, %c0_2] : memref<3072x8xf32, #tpu.memory_space<vmem>>, vector<3072x8xf32>
    %cst = arith.constant dense<0.000000e+00> : vector<1x8xf32>
    %2 = tpu.matmul %0, %1, %cst {dimension_numbers = #tpu.dot_dimension_numbers<[1], [0], [0], [1], [0, 0, 1, 1], [], []>} : vector<1x3072xf32>, vector<3072x8xf32>, vector<1x8xf32> -> vector<1x8xf32>
    %cst_3 = arith.constant 0.000000e+00 : f32
    %3 = vector.broadcast %cst_3 : f32 to vector<1x8xf32>
    %4 = arith.maximumf %2, %3 : vector<1x8xf32>
    %c0_4 = arith.constant 0 : index
    %c0_5 = arith.constant 0 : index
    %5 = vector.load %arg2[%c0_4, %c0_5] : memref<1x8xf32, #tpu.memory_space<vmem>>, vector<1x8xf32>
    tpu.vector_store %arg2[%c0_4, %c0_5], %4 {strides = array<i32>} : memref<1x8xf32, #tpu.memory_space<vmem>>, vector<1x8xf32>,
    return
  }
}

</mosaic_0001>

<bundles_post_ra>
// kernel: model_forward.1
= control target key start
LH: loop header
LB: loop body
LE: loop exit
PB: predicated region body
PF: predicated region fallthrough
CT: control target
= control target key end

     0   :  { %v402_v38 = vlaneseq  ;;  %s3082_s0 = inlined_call_operand.vmem [shape: f32[1,3072], index: 0, kind: input, shape index: {}]   ;;  %s3083_s1 = inlined_call_operand.vmem [shape: f32[3072,8], index: 1, kind: input, shape index: {}]   ;;  %s3084_s2 = inlined_call_operand.hbm [shape: f32[1,8], index: 2, kind: output, shape index: {}]  }
   0x1   :  { %v46_v0 = vld [vmem:[%s3083_s1 + $0xf8] sm:$0xff]  ;;  %v45_v4 = vld [vmem:[%s3083_s1 + $0xf0] sm:$0xff]  ;;  %v44_v8 = vld [vmem:[%s3083_s1 + $0xe8] sm:$0xff] }
   0x2   :  { %v78_v1 = vld [vmem:[%s3083_s1 + $0x1f8] sm:$0xff]  ;;  %1379 = vmatprep.subr.mxu0 %v46_v0  ;;  %v77_v5 = vld [vmem:[%s3083_s1 + $0x1f0] sm:$0xff]  ;;  %v76_v9 = vld [vmem:[%s3083_s1 + $0x1e8] sm:$0xff]  ;;  %v1976_v47 = vshrl.u32 %v402_v38, 7 }
   0x3   :  { %v30_v2 = vld [vmem:[%s3083_s1 + $0x78] sm:$0xff]  ;;  %1414 = vmatprep.subr.mxu1 %v78_v1  ;;  %v29_v6 = vld [vmem:[%s3083_s1 + $0x70] sm:$0xff]  ;;  %v28_v10 = vld [vmem:[%s3083_s1 + $0x68] sm:$0xff] }
   0x4   :  { %v62_v3 = vld [vmem:[%s3083_s1 + $0x178] sm:$0xff]  ;;  %1380 = vmatpush3.msra.mxu0 %v30_v2  ;;  %v61_v7 = vld [vmem:[%s3083_s1 + $0x170] sm:$0xff]  ;;  %v60_v11 = vld [vmem:[%s3083_s1 + $0x168] sm:$0xff]  ;;  %v2003_v56 = vsub.s32 1, %v1976_v47  ;;  %v2017_v60 = vsub.s32 3, %v1976_v47  ;;  %v2026_v63 = vsub.s32 0, %v1976_v47 }
   0x5   :  { %1415 = vmatpush3.msra.mxu1 %v62_v3  ;;  %1381 = vmatprep.subr.mxu0 %v45_v4  ;;  %v43_v12 = vld [vmem:[%s3083_s1 + $0xe0] sm:$0xff]  ;;  %v42_v16 = vld [vmem:[%s3083_s1 + $0xd8] sm:$0xff]  ;;  %v41_v20 = vld [vmem:[%s3083_s1 + $0xd0] sm:$0xff]  ;;  %v2029_v0 = vsub.s32 2, %v1976_v47 }
   0x6   :  { %1416 = vmatprep.subr.mxu1 %v77_v5  ;;  %1382 = vmatpush3.msra.mxu0 %v29_v6  ;;  %v75_v13 = vld [vmem:[%s3083_s1 + $0x1e0] sm:$0xff]  ;;  %v74_v17 = vld [vmem:[%s3083_s1 + $0x1d8] sm:$0xff]  ;;  %v73_v21 = vld [vmem:[%s3083_s1 + $0x1d0] sm:$0xff] }
   0x7   :  { %1417 = vmatpush3.msra.mxu1 %v61_v7  ;;  %1383 = vmatprep.subr.mxu0 %v44_v8  ;;  %v27_v14 = vld [vmem:[%s3083_s1 + $0x60] sm:$0xff]  ;;  %v26_v18 = vld [vmem:[%s3083_s1 + $0x58] sm:$0xff]  ;;  %v25_v22 = vld [vmem:[%s3083_s1 + $0x50] sm:$0xff] }
   0x8   :  { %1418 = vmatprep.subr.mxu1 %v76_v9  ;;  %v59_v15 = vld [vmem:[%s3083_s1 + $0x160] sm:$0xff]  ;;  %1384 = vmatpush3.msra.mxu0 %v28_v10  ;;  %v58_v19 = vld [vmem:[%s3083_s1 + $0x158] sm:$0xff]  ;;  %v57_v23 = vld [vmem:[%s3083_s1 + $0x150] sm:$0xff] }
   0x9   :  { %1419 = vmatpush3.msra.mxu1 %v60_v11  ;;  %1385 = vmatprep.subr.mxu0 %v43_v12  ;;  %v40_v24 = vld [vmem:[%s3083_s1 + $0xc8] sm:$0xff]  ;;  %v39_v28 = vld [vmem:[%s3083_s1 + $0xc0] sm:$0xff]  ;;  %v38_v32 = vld [vmem:[%s3083_s1 + $0xb8] sm:$0xff] }
   0xa   :  { %1420 = vmatprep.subr.mxu1 %v75_v13  ;;  %1386 = vmatpush3.msra.mxu0 %v27_v14  ;;  %v72_v25 = vld [vmem:[%s3083_s1 + $0x1c8] sm:$0xff]  ;;  %v71_v29 = vld [vmem:[%s3083_s1 + $0x1c0] sm:$0xff]  ;;  %v70_v33 = vld [vmem:[%s3083_s1 + $0x1b8] sm:$0xff] }
   0xb   :  { %1421 = vmatpush3.msra.mxu1 %v59_v15  ;;  %1387 = vmatprep.subr.mxu0 %v42_v16  ;;  %v24_v26 = vld [vmem:[%s3083_s1 + $0x48] sm:$0xff]  ;;  %v23_v30 = vld [vmem:[%s3083_s1 + $0x40] sm:$0xff]  ;;  %v22_v34 = vld [vmem:[%s3083_s1 + $0x38] sm:$0xff] }
   0xc   :  { %1422 = vmatprep.subr.mxu1 %v74_v17  ;;  %1388 = vmatpush3.msra.mxu0 %v26_v18  ;;  %v56_v27 = vld [vmem:[%s3083_s1 + $0x148] sm:$0xff]  ;;  %v55_v31 = vld [vmem:[%s3083_s1 + $0x140] sm:$0xff]  ;;  %v54_v35 = vld [vmem:[%s3083_s1 + $0x138] sm:$0xff] }
   0xd   :  { %1423 = vmatpush3.msra.mxu1 %v58_v19  ;;  %1389 = vmatprep.subr.mxu0 %v41_v20  ;;  %v37_v36 = vld [vmem:[%s3083_s1 + $0xb0] sm:$0xff]  ;;  %v36_v41 = vld [vmem:[%s3083_s1 + $0xa8] sm:$0xff]  ;;  %v35_v45 = vld [vmem:[%s3083_s1 + $0xa0] sm:$0xff] }
   0xe   :  { %1424 = vmatprep.subr.mxu1 %v73_v21  ;;  %1390 = vmatpush3.msra.mxu0 %v25_v22  ;;  %v69_v37 = vld [vmem:[%s3083_s1 + $0x1b0] sm:$0xff]  ;;  %v68_v42 = vld [vmem:[%s3083_s1 + $0x1a8] sm:$0xff]  ;;  %v67_v46 = vld [vmem:[%s3083_s1 + $0x1a0] sm:$0xff] }
   0xf   :  { %1425 = vmatpush3.msra.mxu1 %v57_v23  ;;  %1391 = vmatprep.subr.mxu0 %v40_v24  ;;  %v21_v39 = vld [vmem:[%s3083_s1 + $0x30] sm:$0xff]  ;;  %v20_v43 = vld [vmem:[%s3083_s1 + $0x28] sm:$0xff]  ;;  %v19_v48 = vld [vmem:[%s3083_s1 + $0x20] sm:$0xff] }
  0x10   :  { %1426 = vmatprep.subr.mxu1 %v72_v25  ;;  %1392 = vmatpush3.msra.mxu0 %v24_v26  ;;  %v53_v40 = vld [vmem:[%s3083_s1 + $0x130] sm:$0xff]  ;;  %v52_v44 = vld [vmem:[%s3083_s1 + $0x128] sm:$0xff]  ;;  %v51_v49 = vld [vmem:[%s3083_s1 + $0x120] sm:$0xff] }
  0x11   :  { %1427 = vmatpush3.msra.mxu1 %v56_v27  ;;  %1393 = vmatprep.subr.mxu0 %v39_v28  ;;  %v34_v50 = vld [vmem:[%s3083_s1 + $0x98] sm:$0xff]  ;;  %v33_v54 = vld [vmem:[%s3083_s1 + $0x90] sm:$0xff]  ;;  %v2014_v59 = vld [vmem:[%s3082_s0] sm:$0xff] }
  0x12   :  { %1428 = vmatprep.subr.mxu1 %v71_v29  ;;  %1394 = vmatpush3.msra.mxu0 %v23_v30  ;;  %v66_v51 = vld [vmem:[%s3083_s1 + $0x198] sm:$0xff]  ;;  %v65_v55 = vld [vmem:[%s3083_s1 + $0x190] sm:$0xff]  ;;  %v32_v61 = vld [vmem:[%s3083_s1 + $0x88] sm:$0xff]  ;;  %v409_v5 = vrot.slane %v2014_v59, %v2003_v56  ;;  %v417_v7 = vrot.slane %v2014_v59, %v2017_v60  ;;  %v405_v9 = vrot.slane %v2014_v59, %v2026_v63 }
  0x13   :  { %1429 = vmatpush3.msra.mxu1 %v55_v31  ;;  %1395 = vmatprep.subr.mxu0 %v38_v32  ;;  %v18_v52 = vld [vmem:[%s3083_s1 + $0x18] sm:$0xff]  ;;  %v17_v57 = vld [vmem:[%s3083_s1 + $0x10] sm:$0xff]  ;;  %v64_v62 = vld [vmem:[%s3083_s1 + $0x188] sm:$0xff]  ;;  %v413_v10 = vrot.slane %v2014_v59, %v2029_v0 }
  0x14   :  { %1430 = vmatprep.subr.mxu1 %v70_v33  ;;  %1396 = vmatpush3.msra.mxu0 %v22_v34  ;;  %v50_v53 = vld [vmem:[%s3083_s1 + $0x118] sm:$0xff]  ;;  %v49_v58 = vld [vmem:[%s3083_s1 + $0x110] sm:$0xff]  ;;  %v16_v1 = vld [vmem:[%s3083_s1 + $0x8] sm:$0xff] }
  0x15   :  { %1431 = vmatpush3.msra.mxu1 %v54_v35  ;;  %1397 = vmatprep.subr.mxu0 %v37_v36  ;;  %v48_v2 = vld [vmem:[%s3083_s1 + $0x108] sm:$0xff]  ;;  %v31_v3 = vld [vmem:[%s3083_s1 + $0x80] sm:$0xff]  ;;  %v110_v11 = vld [vmem:[%s3083_s1 + $0x2f8] sm:$0xff] }
  0x16   :  { %1432 = vmatprep.subr.mxu1 %v69_v37  ;;  %1398 = vmatpush3.msra.mxu0 %v21_v39  ;;  %v63_v4 = vld [vmem:[%s3083_s1 + $0x180] sm:$0xff]  ;;  %v142_v12 = vld [vmem:[%s3083_s1 + $0x3f8] sm:$0xff]  ;;  %v109_v15 = vld [vmem:[%s3083_s1 + $0x2f0] sm:$0xff] }
  0x17   :  { %1433 = vmatpush3.msra.mxu1 %v53_v40  ;;  %1399 = vmatprep.subr.mxu0 %v36_v41  ;;  %v15_v6 = vld [vmem:[%s3083_s1] sm:$0xff]  ;;  %v94_v13 = vld [vmem:[%s3083_s1 + $0x278] sm:$0xff]  ;;  %v141_v16 = vld [vmem:[%s3083_s1 + $0x3f0] sm:$0xff] }
  0x18   :  { %1434 = vmatprep.subr.mxu1 %v68_v42  ;;  %1400 = vmatpush3.msra.mxu0 %v20_v43  ;;  %v47_v8 = vld [vmem:[%s3083_s1 + $0x100] sm:$0xff]  ;;  %v126_v14 = vld [vmem:[%s3083_s1 + $0x378] sm:$0xff]  ;;  %v93_v17 = vld [vmem:[%s3083_s1 + $0x270] sm:$0xff] }
  0x19   :  { %1435 = vmatpush3.msra.mxu1 %v52_v44  ;;  %1401 = vmatprep.subr.mxu0 %v35_v45  ;;  %v125_v18 = vld [vmem:[%s3083_s1 + $0x370] sm:$0xff]  ;;  %v108_v19 = vld [vmem:[%s3083_s1 + $0x2e8] sm:$0xff]  ;;  %v107_v23 = vld [vmem:[%s3083_s1 + $0x2e0] sm:$0xff] }
  0x1a   :  { %1436 = vmatprep.subr.mxu1 %v67_v46  ;;  %1402 = vmatpush3.msra.mxu0 %v19_v48  ;;  %v140_v20 = vld [vmem:[%s3083_s1 + $0x3e8] sm:$0xff]  ;;  %v139_v24 = vld [vmem:[%s3083_s1 + $0x3e0] sm:$0xff]  ;;  %v106_v27 = vld [vmem:[%s3083_s1 + $0x2d8] sm:$0xff] }
  0x1b   :  { %1437 = vmatpush3.msra.mxu1 %v51_v49  ;;  %1403 = vmatprep.subr.mxu0 %v34_v50  ;;  %v92_v21 = vld [vmem:[%s3083_s1 + $0x268] sm:$0xff]  ;;  %v91_v25 = vld [vmem:[%s3083_s1 + $0x260] sm:$0xff]  ;;  %v138_v28 = vld [vmem:[%s3083_s1 + $0x3d8] sm:$0xff] }
  0x1c   :  { %1438 = vmatprep.subr.mxu1 %v66_v51  ;;  %1404 = vmatpush3.msra.mxu0 %v18_v52  ;;  %v124_v22 = vld [vmem:[%s3083_s1 + $0x368] sm:$0xff]  ;;  %v123_v26 = vld [vmem:[%s3083_s1 + $0x360] sm:$0xff]  ;;  %v90_v29 = vld [vmem:[%s3083_s1 + $0x258] sm:$0xff] }
  0x1d   :  { %1439 = vmatpush3.msra.mxu1 %v50_v53  ;;  %1405 = vmatprep.subr.mxu0 %v33_v54  ;;  %v122_v30 = vld [vmem:[%s3083_s1 + $0x358] sm:$0xff]  ;;  %v105_v31 = vld [vmem:[%s3083_s1 + $0x2d0] sm:$0xff]  ;;  %v104_v35 = vld [vmem:[%s3083_s1 + $0x2c8] sm:$0xff] }
  0x1e   :  { %1440 = vmatprep.subr.mxu1 %v65_v55  ;;  %1406 = vmatpush3.msra.mxu0 %v17_v57  ;;  %v137_v32 = vld [vmem:[%s3083_s1 + $0x3d0] sm:$0xff]  ;;  %v136_v36 = vld [vmem:[%s3083_s1 + $0x3c8] sm:$0xff]  ;;  %v103_v39 = vld [vmem:[%s3083_s1 + $0x2c0] sm:$0xff] }
  0x1f   :  { %1441 = vmatpush3.msra.mxu1 %v49_v58  ;;  %1407 = vmatprep.subr.mxu0 %v32_v61  ;;  %v89_v33 = vld [vmem:[%s3083_s1 + $0x250] sm:$0xff]  ;;  %v88_v37 = vld [vmem:[%s3083_s1 + $0x248] sm:$0xff]  ;;  %v135_v40 = vld [vmem:[%s3083_s1 + $0x3c0] sm:$0xff] }
  0x20   :  { %1442 = vmatprep.subr.mxu1 %v64_v62  ;;  %1408 = vmatpush3.msra.mxu0 %v16_v1  ;;  %v121_v34 = vld [vmem:[%s3083_s1 + $0x350] sm:$0xff]  ;;  %v120_v38 = vld [vmem:[%s3083_s1 + $0x348] sm:$0xff]  ;;  %v87_v41 = vld [vmem:[%s3083_s1 + $0x240] sm:$0xff] }
  0x21   :  { %1443 = vmatpush3.msra.mxu1 %v48_v2  ;;  %1409 = vmatprep.subr.mxu0 %v31_v3  ;;  %v119_v42 = vld [vmem:[%s3083_s1 + $0x340] sm:$0xff]  ;;  %v102_v43 = vld [vmem:[%s3083_s1 + $0x2b8] sm:$0xff]  ;;  %v101_v48 = vld [vmem:[%s3083_s1 + $0x2b0] sm:$0xff] }
  0x22   :  { %1444 = vmatprep.subr.mxu1 %v63_v4  ;;  %1410 = vmatpush3.msra.mxu0 %v15_v6  ;;  %v134_v44 = vld [vmem:[%s3083_s1 + $0x3b8] sm:$0xff]  ;;  %v133_v49 = vld [vmem:[%s3083_s1 + $0x3b0] sm:$0xff]  ;;  %v100_v52 = vld [vmem:[%s3083_s1 + $0x2a8] sm:$0xff] }
  0x23   :  { %586 = vmatprep.mubr.f32.mxu0 %v409_v5  ;;  %1445 = vmatpush3.msra.mxu1 %v47_v8  ;;  %v86_v45 = vld [vmem:[%s3083_s1 + $0x238] sm:$0xff]  ;;  %v85_v50 = vld [vmem:[%s3083_s1 + $0x230] sm:$0xff]  ;;  %v132_v53 = vld [vmem:[%s3083_s1 + $0x3a8] sm:$0xff] }
  0x24   :  { %656 = vmatprep.mubr.f32.mxu1 %v417_v7  ;;  %587 = vmatmul.mubr.f32.vlgmr.msra.gmra.mxu0 %v405_v9  ;;  %v118_v46 = vld [vmem:[%s3083_s1 + $0x338] sm:$0xff]  ;;  %v117_v51 = vld [vmem:[%s3083_s1 + $0x330] sm:$0xff]  ;;  %v84_v54 = vld [vmem:[%s3083_s1 + $0x228] sm:$0xff]  ;;  %v2220_v7 = vsub.s32 5, %v1976_v47 }
  0x25   :  { %657 = vmatmul.mubr.f32.vlgmr.msra.gmra.mxu1 %v413_v10  ;;  %1449 = vmatprep.subr.mxu0 %v110_v11  ;;  %v116_v55 = vld [vmem:[%s3083_s1 + $0x328] sm:$0xff]  ;;  %v99_v57 = vld [vmem:[%s3083_s1 + $0x2a0] sm:$0xff]  ;;  %v98_v1 = vld [vmem:[%s3083_s1 + $0x298] sm:$0xff]  ;;  %v2229_v10 = vsub.s32 4, %v1976_v47 }
  0x26   :  { %1484 = vmatprep.subr.mxu1 %v142_v12  ;;  %1450 = vmatpush3.msra.mxu0 %v94_v13  ;;  %v131_v58 = vld [vmem:[%s3083_s1 + $0x3a0] sm:$0xff]  ;;  %v130_v2 = vld [vmem:[%s3083_s1 + $0x398] sm:$0xff]  ;;  %v97_v5 = vld [vmem:[%s3083_s1 + $0x290] sm:$0xff]  ;;  %v2238_v13 = vsub.s32 7, %v1976_v47 }
  0x27   :  { %1485 = vmatpush3.msra.mxu1 %v126_v14  ;;  %1451 = vmatprep.subr.mxu0 %v109_v15  ;;  %v83_v61 = vld [vmem:[%s3083_s1 + $0x220] sm:$0xff]  ;;  %v82_v3 = vld [vmem:[%s3083_s1 + $0x218] sm:$0xff]  ;;  %v129_v6 = vld [vmem:[%s3083_s1 + $0x390] sm:$0xff] }
  0x28   :  { %1486 = vmatprep.subr.mxu1 %v141_v16  ;;  %1452 = vmatpush3.msra.mxu0 %v93_v17  ;;  %v115_v62 = vld [vmem:[%s3083_s1 + $0x320] sm:$0xff]  ;;  %v114_v4 = vld [vmem:[%s3083_s1 + $0x318] sm:$0xff]  ;;  %v81_v8 = vld [vmem:[%s3083_s1 + $0x210] sm:$0xff]  ;;  %v2247_v16 = vsub.s32 6, %v1976_v47 }
  0x29   :  { %1487 = vmatpush3.msra.mxu1 %v125_v18  ;;  %1453 = vmatprep.subr.mxu0 %v108_v19  ;;  %v113_v9 = vld [vmem:[%s3083_s1 + $0x310] sm:$0xff]  ;;  %v96_v11 = vld [vmem:[%s3083_s1 + $0x288] sm:$0xff]  ;;  %v95_v17 = vld [vmem:[%s3083_s1 + $0x280] sm:$0xff]  ;;  %v425_v19 = vrot.slane %v2014_v59, %v2220_v7 }
  0x2a   :  { %1488 = vmatprep.subr.mxu1 %v140_v20  ;;  %1454 = vmatpush3.msra.mxu0 %v92_v21  ;;  %v128_v12 = vld [vmem:[%s3083_s1 + $0x388] sm:$0xff]  ;;  %v127_v18 = vld [vmem:[%s3083_s1 + $0x380] sm:$0xff]  ;;  %v421_v20 = vrot.slane %v2014_v59, %v2229_v10 }
  0x2b   :  { %1489 = vmatpush3.msra.mxu1 %v124_v22  ;;  %1455 = vmatprep.subr.mxu0 %v107_v23  ;;  %v80_v14 = vld [vmem:[%s3083_s1 + $0x208] sm:$0xff]  ;;  %v79_v47 = vld [vmem:[%s3083_s1 + $0x200] sm:$0xff]  ;;  %v433_v22 = vrot.slane %v2014_v59, %v2238_v13  ;;  %v174_v23 = vld [vmem:[%s3083_s1 + $0x4f8] sm:$0xff] }
  0x2c   :  { %1490 = vmatprep.subr.mxu1 %v139_v24  ;;  %1456 = vmatpush3.msra.mxu0 %v91_v25  ;;  %v112_v15 = vld [vmem:[%s3083_s1 + $0x308] sm:$0xff]  ;;  %v111_v21 = vld [vmem:[%s3083_s1 + $0x300] sm:$0xff]  ;;  %v429_v24 = vrot.slane %v2014_v59, %v2247_v16  ;;  %v206_v25 = vld [vmem:[%s3083_s1 + $0x5f8] sm:$0xff] }
  0x2d   :  { %1491 = vmatpush3.msra.mxu1 %v123_v26  ;;  %1457 = vmatprep.subr.mxu0 %v106_v27  ;;  %v158_v26 = vld [vmem:[%s3083_s1 + $0x478] sm:$0xff]  ;;  %v173_v59 = vld [vmem:[%s3083_s1 + $0x4f0] sm:$0xff] }
  0x2e   :  { %1492 = vmatprep.subr.mxu1 %v138_v28  ;;  %1458 = vmatpush3.msra.mxu0 %v90_v29  ;;  %v190_v27 = vld [vmem:[%s3083_s1 + $0x578] sm:$0xff]  ;;  %v205_v28 = vld [vmem:[%s3083_s1 + $0x5f0] sm:$0xff] }
  0x2f   :  { %1493 = vmatpush3.msra.mxu1 %v122_v30  ;;  %1459 = vmatprep.subr.mxu0 %v105_v31  ;;  %v157_v29 = vld [vmem:[%s3083_s1 + $0x470] sm:$0xff]  ;;  %v172_v31 = vld [vmem:[%s3083_s1 + $0x4e8] sm:$0xff] }
  0x30   :  { %1494 = vmatprep.subr.mxu1 %v137_v32  ;;  %1460 = vmatpush3.msra.mxu0 %v89_v33  ;;  %v189_v30 = vld [vmem:[%s3083_s1 + $0x570] sm:$0xff]  ;;  %v204_v32 = vld [vmem:[%s3083_s1 + $0x5e8] sm:$0xff] }
  0x31   :  { %1495 = vmatpush3.msra.mxu1 %v121_v34  ;;  %1461 = vmatprep.subr.mxu0 %v104_v35  ;;  %v156_v33 = vld [vmem:[%s3083_s1 + $0x468] sm:$0xff]  ;;  %v171_v35 = vld [vmem:[%s3083_s1 + $0x4e0] sm:$0xff] }
  0x32   :  { %1496 = vmatprep.subr.mxu1 %v136_v36  ;;  %1462 = vmatpush3.msra.mxu0 %v88_v37  ;;  %v188_v34 = vld [vmem:[%s3083_s1 + $0x568] sm:$0xff]  ;;  %v203_v36 = vld [vmem:[%s3083_s1 + $0x5e0] sm:$0xff] }
  0x33   :  { %1497 = vmatpush3.msra.mxu1 %v120_v38  ;;  %1463 = vmatprep.subr.mxu0 %v103_v39  ;;  %v155_v37 = vld [vmem:[%s3083_s1 + $0x460] sm:$0xff]  ;;  %v170_v39 = vld [vmem:[%s3083_s1 + $0x4d8] sm:$0xff] }
  0x34   :  { %1498 = vmatprep.subr.mxu1 %v135_v40  ;;  %1464 = vmatpush3.msra.mxu0 %v87_v41  ;;  %v187_v38 = vld [vmem:[%s3083_s1 + $0x560] sm:$0xff]  ;;  %v202_v40 = vld [vmem:[%s3083_s1 + $0x5d8] sm:$0xff] }
  0x35   :  { %1499 = vmatpush3.msra.mxu1 %v119_v42  ;;  %1465 = vmatprep.subr.mxu0 %v102_v43  ;;  %v154_v41 = vld [vmem:[%s3083_s1 + $0x458] sm:$0xff]  ;;  %v169_v43 = vld [vmem:[%s3083_s1 + $0x4d0] sm:$0xff] }
  0x36   :  { %1500 = vmatprep.subr.mxu1 %v134_v44  ;;  %1466 = vmatpush3.msra.mxu0 %v86_v45  ;;  %v186_v42 = vld [vmem:[%s3083_s1 + $0x558] sm:$0xff]  ;;  %v201_v44 = vld [vmem:[%s3083_s1 + $0x5d0] sm:$0xff] }
  0x37   :  { %1501 = vmatpush3.msra.mxu1 %v118_v46  ;;  %1467 = vmatprep.subr.mxu0 %v101_v48  ;;  %v153_v45 = vld [vmem:[%s3083_s1 + $0x450] sm:$0xff]  ;;  %v168_v48 = vld [vmem:[%s3083_s1 + $0x4c8] sm:$0xff] }
  0x38   :  { %1502 = vmatprep.subr.mxu1 %v133_v49  ;;  %1468 = vmatpush3.msra.mxu0 %v85_v50  ;;  %v185_v46 = vld [vmem:[%s3083_s1 + $0x550] sm:$0xff]  ;;  %v200_v49 = vld [vmem:[%s3083_s1 + $0x5c8] sm:$0xff] }
  0x39   :  { %1503 = vmatpush3.msra.mxu1 %v117_v51  ;;  %1469 = vmatprep.subr.mxu0 %v100_v52  ;;  %v152_v50 = vld [vmem:[%s3083_s1 + $0x448] sm:$0xff]  ;;  %v167_v52 = vld [vmem:[%s3083_s1 + $0x4c0] sm:$0xff] }
  0x3a   :  { %1504 = vmatprep.subr.mxu1 %v132_v53  ;;  %1470 = vmatpush3.msra.mxu0 %v84_v54  ;;  %v184_v51 = vld [vmem:[%s3083_s1 + $0x548] sm:$0xff]  ;;  %v199_v53 = vld [vmem:[%s3083_s1 + $0x5c0] sm:$0xff] }
  0x3b   :  { %1505 = vmatpush3.msra.mxu1 %v116_v55  ;;  %1471 = vmatprep.subr.mxu0 %v99_v57  ;;  %v151_v54 = vld [vmem:[%s3083_s1 + $0x440] sm:$0xff]  ;;  %v166_v57 = vld [vmem:[%s3083_s1 + $0x4b8] sm:$0xff] }
  0x3c   :  { %1506 = vmatprep.subr.mxu1 %v131_v58  ;;  %1472 = vmatpush3.msra.mxu0 %v83_v61  ;;  %v183_v55 = vld [vmem:[%s3083_s1 + $0x540] sm:$0xff]  ;;  %v198_v58 = vld [vmem:[%s3083_s1 + $0x5b8] sm:$0xff] }
  0x3d   :  { %1507 = vmatpush3.msra.mxu1 %v115_v62  ;;  %1473 = vmatprep.subr.mxu0 %v98_v1  ;;  %v150_v61 = vld [vmem:[%s3083_s1 + $0x438] sm:$0xff]  ;;  %v165_v1 = vld [vmem:[%s3083_s1 + $0x4b0] sm:$0xff] }
  0x3e   :  { %1508 = vmatprep.subr.mxu1 %v130_v2  ;;  %1474 = vmatpush3.msra.mxu0 %v82_v3  ;;  %v182_v62 = vld [vmem:[%s3083_s1 + $0x538] sm:$0xff]  ;;  %v197_v2 = vld [vmem:[%s3083_s1 + $0x5b0] sm:$0xff] }
  0x3f   :  { %1509 = vmatpush3.msra.mxu1 %v114_v4  ;;  %1475 = vmatprep.subr.mxu0 %v97_v5  ;;  %v149_v3 = vld [vmem:[%s3083_s1 + $0x430] sm:$0xff]  ;;  %v164_v5 = vld [vmem:[%s3083_s1 + $0x4a8] sm:$0xff] }
  0x40   :  { %1510 = vmatprep.subr.mxu1 %v129_v6  ;;  %1476 = vmatpush3.msra.mxu0 %v81_v8  ;;  %v181_v4 = vld [vmem:[%s3083_s1 + $0x530] sm:$0xff]  ;;  %v196_v6 = vld [vmem:[%s3083_s1 + $0x5a8] sm:$0xff] }
  0x41   :  { %1511 = vmatpush3.msra.mxu1 %v113_v9  ;;  %1477 = vmatprep.subr.mxu0 %v96_v11  ;;  %v148_v8 = vld [vmem:[%s3083_s1 + $0x428] sm:$0xff]  ;;  %v163_v11 = vld [vmem:[%s3083_s1 + $0x4a0] sm:$0xff] }
  0x42   :  { %1512 = vmatprep.subr.mxu1 %v128_v12  ;;  %1478 = vmatpush3.msra.mxu0 %v80_v14  ;;  %v180_v9 = vld [vmem:[%s3083_s1 + $0x528] sm:$0xff]  ;;  %v195_v12 = vld [vmem:[%s3083_s1 + $0x5a0] sm:$0xff] }
  0x43   :  { %1513 = vmatpush3.msra.mxu1 %v112_v15  ;;  %1479 = vmatprep.subr.mxu0 %v95_v17  ;;  %v147_v14 = vld [vmem:[%s3083_s1 + $0x420] sm:$0xff]  ;;  %v162_v17 = vld [vmem:[%s3083_s1 + $0x498] sm:$0xff] }
  0x44   :  { %1514 = vmatprep.subr.mxu1 %v127_v18  ;;  %1480 = vmatpush3.msra.mxu0 %v79_v47  ;;  %v179_v15 = vld [vmem:[%s3083_s1 + $0x520] sm:$0xff]  ;;  %v194_v18 = vld [vmem:[%s3083_s1 + $0x598] sm:$0xff] }
  0x45   :  { %726 = vmatprep.mubr.f32.mxu0 %v425_v19  ;;  %1515 = vmatpush3.msra.mxu1 %v111_v21  ;;  %v146_v19 = vld [vmem:[%s3083_s1 + $0x418] sm:$0xff]  ;;  %v193_v21 = vld [vmem:[%s3083_s1 + $0x590] sm:$0xff] }
  0x46   :  { %727 = vmatmul.mubr.f32.vlgmr.msra.gmra.mxu0 %v421_v20  ;;  %796 = vmatprep.mubr.f32.mxu1 %v433_v22  ;;  %v178_v47 = vld [vmem:[%s3083_s1 + $0x518] sm:$0xff]  ;;  %v161_v20 = vld [vmem:[%s3083_s1 + $0x490] sm:$0xff] }
  0x47   :  { %1519 = vmatprep.subr.mxu0 %v174_v23  ;;  %1554 = vmatprep.subr.mxu1 %v206_v25  ;;  %v145_v22 = vld [vmem:[%s3083_s1 + $0x410] sm:$0xff]  ;;  %v160_v25 = vld [vmem:[%s3083_s1 + $0x488] sm:$0xff] }
  0x48   :  { %797 = vmatmul.mubr.f32.vlgmr.msra.gmra.mxu1 %v429_v24  ;;  %1520 = vmatpush3.msra.mxu0 %v158_v26  ;;  %v177_v23 = vld [vmem:[%s3083_s1 + $0x510] sm:$0xff]  ;;  %v2440_v24 = vld [vmem:[%s3082_s0 + $0x8] sm:$0xff] }
  0x49   :  { %1555 = vmatpush3.msra.mxu1 %v190_v27  ;;  %1521 = vmatprep.subr.mxu0 %v173_v59  ;;  %v192_v26 = vld [vmem:[%s3083_s1 + $0x588] sm:$0xff] }
  0x4a   :  { %1556 = vmatprep.subr.mxu1 %v205_v28  ;;  %1522 = vmatpush3.msra.mxu0 %v157_v29  ;;  %v144_v27 = vld [vmem:[%s3083_s1 + $0x408] sm:$0xff]  ;;  %v159_v28 = vld [vmem:[%s3083_s1 + $0x480] sm:$0xff] }
  0x4b   :  { %1557 = vmatpush3.msra.mxu1 %v189_v30  ;;  %1523 = vmatprep.subr.mxu0 %v172_v31  ;;  %v176_v59 = vld [vmem:[%s3083_s1 + $0x508] sm:$0xff]  ;;  %v191_v29 = vld [vmem:[%s3083_s1 + $0x580] sm:$0xff]  ;;  %v441_v30 = vrot.slane %v2440_v24, %v2003_v56 }
  0x4c   :  { %1558 = vmatprep.subr.mxu1 %v204_v32  ;;  %1524 = vmatpush3.msra.mxu0 %v156_v33  ;;  %v143_v31 = vld [vmem:[%s3083_s1 + $0x400] sm:$0xff]  ;;  %v437_v32 = vrot.slane %v2440_v24, %v2026_v63 }
  0x4d   :  { %1559 = vmatpush3.msra.mxu1 %v188_v34  ;;  %1525 = vmatprep.subr.mxu0 %v171_v35  ;;  %v175_v33 = vld [vmem:[%s3083_s1 + $0x500] sm:$0xff]  ;;  %v449_v34 = vrot.slane %v2440_v24, %v2017_v60  ;;  %v238_v35 = vld [vmem:[%s3083_s1 + $0x6f8] sm:$0xff] }
  0x4e   :  { %1560 = vmatprep.subr.mxu1 %v203_v36  ;;  %1526 = vmatpush3.msra.mxu0 %v155_v37  ;;  %v445_v36 = vrot.slane %v2440_v24, %v2029_v0  ;;  %v270_v37 = vld [vmem:[%s3083_s1 + $0x7f8] sm:$0xff] }
  0x4f   :  { %1561 = vmatpush3.msra.mxu1 %v187_v38  ;;  %1527 = vmatprep.subr.mxu0 %v170_v39  ;;  %v222_v38 = vld [vmem:[%s3083_s1 + $0x678] sm:$0xff] }
  0x50   :  { %1562 = vmatprep.subr.mxu1 %v202_v40  ;;  %1528 = vmatpush3.msra.mxu0 %v154_v41  ;;  %v254_v39 = vld [vmem:[%s3083_s1 + $0x778] sm:$0xff]  ;;  %v237_v40 = vld [vmem:[%s3083_s1 + $0x6f0] sm:$0xff] }
  0x51   :  { %1563 = vmatpush3.msra.mxu1 %v186_v42  ;;  %1529 = vmatprep.subr.mxu0 %v169_v43  ;;  %v269_v41 = vld [vmem:[%s3083_s1 + $0x7f0] sm:$0xff] }
  0x52   :  { %1564 = vmatprep.subr.mxu1 %v201_v44  ;;  %1530 = vmatpush3.msra.mxu0 %v153_v45  ;;  %v221_v42 = vld [vmem:[%s3083_s1 + $0x670] sm:$0xff]  ;;  %v236_v44 = vld [vmem:[%s3083_s1 + $0x6e8] sm:$0xff] }
  0x53   :  { %1565 = vmatpush3.msra.mxu1 %v185_v46  ;;  %1531 = vmatprep.subr.mxu0 %v168_v48  ;;  %v253_v43 = vld [vmem:[%s3083_s1 + $0x770] sm:$0xff]  ;;  %v268_v45 = vld [vmem:[%s3083_s1 + $0x7e8] sm:$0xff] }
  0x54   :  { %1566 = vmatprep.subr.mxu1 %v200_v49  ;;  %1532 = vmatpush3.msra.mxu0 %v152_v50  ;;  %v220_v46 = vld [vmem:[%s3083_s1 + $0x668] sm:$0xff]  ;;  %v235_v49 = vld [vmem:[%s3083_s1 + $0x6e0] sm:$0xff] }
  0x55   :  { %1567 = vmatpush3.msra.mxu1 %v184_v51  ;;  %1533 = vmatprep.subr.mxu0 %v167_v52  ;;  %v252_v48 = vld [vmem:[%s3083_s1 + $0x768] sm:$0xff]  ;;  %v267_v50 = vld [vmem:[%s3083_s1 + $0x7e0] sm:$0xff] }
  0x56   :  { %1568 = vmatprep.subr.mxu1 %v199_v53  ;;  %1534 = vmatpush3.msra.mxu0 %v151_v54  ;;  %v219_v51 = vld [vmem:[%s3083_s1 + $0x660] sm:$0xff]  ;;  %v234_v53 = vld [vmem:[%s3083_s1 + $0x6d8] sm:$0xff] }
  0x57   :  { %1569 = vmatpush3.msra.mxu1 %v183_v55  ;;  %1535 = vmatprep.subr.mxu0 %v166_v57  ;;  %v251_v52 = vld [vmem:[%s3083_s1 + $0x760] sm:$0xff]  ;;  %v266_v54 = vld [vmem:[%s3083_s1 + $0x7d8] sm:$0xff] }
  0x58   :  { %1570 = vmatprep.subr.mxu1 %v198_v58  ;;  %1536 = vmatpush3.msra.mxu0 %v150_v61  ;;  %v218_v55 = vld [vmem:[%s3083_s1 + $0x658] sm:$0xff]  ;;  %v233_v58 = vld [vmem:[%s3083_s1 + $0x6d0] sm:$0xff] }
  0x59   :  { %1571 = vmatpush3.msra.mxu1 %v182_v62  ;;  %1537 = vmatprep.subr.mxu0 %v165_v1  ;;  %v250_v57 = vld [vmem:[%s3083_s1 + $0x758] sm:$0xff]  ;;  %v265_v61 = vld [vmem:[%s3083_s1 + $0x7d0] sm:$0xff] }
  0x5a   :  { %1572 = vmatprep.subr.mxu1 %v197_v2  ;;  %1538 = vmatpush3.msra.mxu0 %v149_v3  ;;  %v217_v62 = vld [vmem:[%s3083_s1 + $0x650] sm:$0xff]  ;;  %v232_v2 = vld [vmem:[%s3083_s1 + $0x6c8] sm:$0xff] }
  0x5b   :  { %1573 = vmatpush3.msra.mxu1 %v181_v4  ;;  %1539 = vmatprep.subr.mxu0 %v164_v5  ;;  %v249_v1 = vld [vmem:[%s3083_s1 + $0x750] sm:$0xff]  ;;  %v264_v3 = vld [vmem:[%s3083_s1 + $0x7c8] sm:$0xff] }
  0x5c   :  { %1574 = vmatprep.subr.mxu1 %v196_v6  ;;  %1540 = vmatpush3.msra.mxu0 %v148_v8  ;;  %v216_v4 = vld [vmem:[%s3083_s1 + $0x648] sm:$0xff]  ;;  %v231_v6 = vld [vmem:[%s3083_s1 + $0x6c0] sm:$0xff] }
  0x5d   :  { %1575 = vmatpush3.msra.mxu1 %v180_v9  ;;  %1541 = vmatprep.subr.mxu0 %v163_v11  ;;  %v248_v5 = vld [vmem:[%s3083_s1 + $0x748] sm:$0xff]  ;;  %v263_v8 = vld [vmem:[%s3083_s1 + $0x7c0] sm:$0xff] }
  0x5e   :  { %1576 = vmatprep.subr.mxu1 %v195_v12  ;;  %1542 = vmatpush3.msra.mxu0 %v147_v14  ;;  %v215_v9 = vld [vmem:[%s3083_s1 + $0x640] sm:$0xff]  ;;  %v230_v12 = vld [vmem:[%s3083_s1 + $0x6b8] sm:$0xff] }
  0x5f   :  { %1577 = vmatpush3.msra.mxu1 %v179_v15  ;;  %1543 = vmatprep.subr.mxu0 %v162_v17  ;;  %v247_v11 = vld [vmem:[%s3083_s1 + $0x740] sm:$0xff]  ;;  %v262_v14 = vld [vmem:[%s3083_s1 + $0x7b8] sm:$0xff] }
  0x60   :  { %1578 = vmatprep.subr.mxu1 %v194_v18  ;;  %1544 = vmatpush3.msra.mxu0 %v146_v19  ;;  %v214_v15 = vld [vmem:[%s3083_s1 + $0x638] sm:$0xff]  ;;  %v229_v18 = vld [vmem:[%s3083_s1 + $0x6b0] sm:$0xff] }
  0x61   :  { %1579 = vmatpush3.msra.mxu1 %v178_v47  ;;  %1545 = vmatprep.subr.mxu0 %v161_v20  ;;  %v246_v17 = vld [vmem:[%s3083_s1 + $0x738] sm:$0xff]  ;;  %v261_v19 = vld [vmem:[%s3083_s1 + $0x7b0] sm:$0xff] }
  0x62   :  { %1580 = vmatprep.subr.mxu1 %v193_v21  ;;  %1546 = vmatpush3.msra.mxu0 %v145_v22  ;;  %v213_v47 = vld [vmem:[%s3083_s1 + $0x630] sm:$0xff]  ;;  %v228_v21 = vld [vmem:[%s3083_s1 + $0x6a8] sm:$0xff] }
  0x63   :  { %1581 = vmatpush3.msra.mxu1 %v177_v23  ;;  %1547 = vmatprep.subr.mxu0 %v160_v25  ;;  %v245_v20 = vld [vmem:[%s3083_s1 + $0x730] sm:$0xff]  ;;  %v260_v22 = vld [vmem:[%s3083_s1 + $0x7a8] sm:$0xff] }
  0x64   :  { %1582 = vmatprep.subr.mxu1 %v192_v26  ;;  %1548 = vmatpush3.msra.mxu0 %v144_v27  ;;  %v212_v23 = vld [vmem:[%s3083_s1 + $0x628] sm:$0xff]  ;;  %v227_v26 = vld [vmem:[%s3083_s1 + $0x6a0] sm:$0xff] }
  0x65   :  { %1583 = vmatpush3.msra.mxu1 %v176_v59  ;;  %1549 = vmatprep.subr.mxu0 %v159_v28  ;;  %v244_v25 = vld [vmem:[%s3083_s1 + $0x728] sm:$0xff]  ;;  %v259_v27 = vld [vmem:[%s3083_s1 + $0x7a0] sm:$0xff] }
  0x66   :  { %1584 = vmatprep.subr.mxu1 %v191_v29  ;;  %1550 = vmatpush3.msra.mxu0 %v143_v31  ;;  %v211_v59 = vld [vmem:[%s3083_s1 + $0x620] sm:$0xff]  ;;  %v226_v29 = vld [vmem:[%s3083_s1 + $0x698] sm:$0xff] }
  0x67   :  { %866 = vmatprep.mubr.f32.mxu0 %v441_v30  ;;  %1585 = vmatpush3.msra.mxu1 %v175_v33  ;;  %v243_v28 = vld [vmem:[%s3083_s1 + $0x720] sm:$0xff]  ;;  %v258_v30 = vld [vmem:[%s3083_s1 + $0x798] sm:$0xff]  ;;  %v225_v33 = vld [vmem:[%s3083_s1 + $0x690] sm:$0xff] }
  0x68   :  { %867 = vmatmul.mubr.f32.vlgmr.msra.gmra.mxu0 %v437_v32  ;;  %936 = vmatprep.mubr.f32.mxu1 %v449_v34  ;;  %v210_v31 = vld [vmem:[%s3083_s1 + $0x618] sm:$0xff]  ;;  %v257_v34 = vld [vmem:[%s3083_s1 + $0x790] sm:$0xff] }
  0x69   :  { %1589 = vmatprep.subr.mxu0 %v238_v35  ;;  %1624 = vmatprep.subr.mxu1 %v270_v37  ;;  %v242_v32 = vld [vmem:[%s3083_s1 + $0x718] sm:$0xff]  ;;  %v209_v35 = vld [vmem:[%s3083_s1 + $0x610] sm:$0xff]  ;;  %v224_v37 = vld [vmem:[%s3083_s1 + $0x688] sm:$0xff] }
  0x6a   :  { %937 = vmatmul.mubr.f32.vlgmr.msra.gmra.mxu1 %v445_v36  ;;  %1590 = vmatpush3.msra.mxu0 %v222_v38  ;;  %v241_v36 = vld [vmem:[%s3083_s1 + $0x710] sm:$0xff]  ;;  %v256_v38 = vld [vmem:[%s3083_s1 + $0x788] sm:$0xff] }
  0x6b   :  { %1625 = vmatpush3.msra.mxu1 %v254_v39  ;;  %1591 = vmatprep.subr.mxu0 %v237_v40  ;;  %v208_v39 = vld [vmem:[%s3083_s1 + $0x608] sm:$0xff] }
  0x6c   :  { %1626 = vmatprep.subr.mxu1 %v269_v41  ;;  %1592 = vmatpush3.msra.mxu0 %v221_v42  ;;  %v240_v40 = vld [vmem:[%s3083_s1 + $0x708] sm:$0xff] }
  0x6d   :  { %1627 = vmatpush3.msra.mxu1 %v253_v43  ;;  %1593 = vmatprep.subr.mxu0 %v236_v44 }
  0x6e   :  { %1628 = vmatprep.subr.mxu1 %v268_v45  ;;  %1594 = vmatpush3.msra.mxu0 %v220_v46 }
  0x6f   :  { %1629 = vmatpush3.msra.mxu1 %v252_v48  ;;  %1595 = vmatprep.subr.mxu0 %v235_v49 }
  0x70   :  { %1630 = vmatprep.subr.mxu1 %v267_v50  ;;  %1596 = vmatpush3.msra.mxu0 %v219_v51 }
  0x71   :  { %1631 = vmatpush3.msra.mxu1 %v251_v52  ;;  %1597 = vmatprep.subr.mxu0 %v234_v53 }
  0x72   :  { %1632 = vmatprep.subr.mxu1 %v266_v54  ;;  %1598 = vmatpush3.msra.mxu0 %v218_v55 }
  0x73   :  { %1633 = vmatpush3.msra.mxu1 %v250_v57  ;;  %1599 = vmatprep.subr.mxu0 %v233_v58 }
  0x74   :  { %1634 = vmatprep.subr.mxu1 %v265_v61  ;;  %1600 = vmatpush3.msra.mxu0 %v217_v62 }
  0x75   :  { %1635 = vmatpush3.msra.mxu1 %v249_v1  ;;  %1601 = vmatprep.subr.mxu0 %v232_v2 }
  0x76   :  { %1636 = vmatprep.subr.mxu1 %v264_v3  ;;  %1602 = vmatpush3.msra.mxu0 %v216_v4 }
  0x77   :  { %1637 = vmatpush3.msra.mxu1 %v248_v5  ;;  %1603 = vmatprep.subr.mxu0 %v231_v6 }
  0x78   :  { %1638 = vmatprep.subr.mxu1 %v263_v8  ;;  %1604 = vmatpush3.msra.mxu0 %v215_v9 }
  0x79   :  { %1639 = vmatpush3.msra.mxu1 %v247_v11  ;;  %1605 = vmatprep.subr.mxu0 %v230_v12 }
  0x7a   :  { %1640 = vmatprep.subr.mxu1 %v262_v14  ;;  %1606 = vmatpush3.msra.mxu0 %v214_v15 }
  0x7b   :  { %1641 = vmatpush3.msra.mxu1 %v246_v17  ;;  %1607 = vmatprep.subr.mxu0 %v229_v18 }
  0x7c   :  { %1642 = vmatprep.subr.mxu1 %v261_v19  ;;  %1608 = vmatpush3.msra.mxu0 %v213_v47 }
  0x7d   :  { %1643 = vmatpush3.msra.mxu1 %v245_v20  ;;  %1609 = vmatprep.subr.mxu0 %v228_v21 }
  0x7e   :  { %1644 = vmatprep.subr.mxu1 %v260_v22  ;;  %1610 = vmatpush3.msra.mxu0 %v212_v23 }
  0x7f   :  { %1645 = vmatpush3.msra.mxu1 %v244_v25  ;;  %1611 = vmatprep.subr.mxu0 %v227_v26 }
  0x80   :  { %1646 = vmatprep.subr.mxu1 %v259_v27  ;;  %1612 = vmatpush3.msra.mxu0 %v211_v59 }
  0x81   :  { %1647 = vmatpush3.msra.mxu1 %v243_v28  ;;  %1613 = vmatprep.subr.mxu0 %v226_v29 }
  0x82   :  { %1648 = vmatprep.subr.mxu1 %v258_v30  ;;  %1614 = vmatpush3.msra.mxu0 %v210_v31 }
  0x83   :  { %1649 = vmatpush3.msra.mxu1 %v242_v32  ;;  %1615 = vmatprep.subr.mxu0 %v225_v33 }
  0x84   :  { %1650 = vmatprep.subr.mxu1 %v257_v34 }
  0x85   :  { %7 = vsyncpa [#allocation3], 0  ;;  %1616 = vmatpush3.msra.mxu0 %v209_v35  ;;  %1651 = vmatpush3.msra.mxu1 %v241_v36  ;;  %v223_v41 = vld [vmem:[%s3083_s1 + $0x680] sm:$0xff]  ;;  %v457_v43 = vrot.slane %v2440_v24, %v2220_v7  ;;  %v453_v45 = vrot.slane %v2440_v24, %v2229_v10  ;;  %v465_v48 = vrot.slane %v2440_v24, %v2238_v13  ;;  %v302_v49 = vld [vmem:[%s3083_s1 + $0x8f8] sm:$0xff]  ;;  %vm1363_vm0 = vcmask 57344  }
  0x86   :  { %v255_v42 = vld [vmem:[%s3083_s1 + $0x780] sm:$0xff]  ;;  %1617 = vmatprep.subr.mxu0 %v224_v37  ;;  %1652 = vmatprep.subr.mxu1 %v256_v38  ;;  %v461_v50 = vrot.slane %v2440_v24, %v2247_v16  ;;  %v334_v51 = vld [vmem:[%s3083_s1 + $0x9f8] sm:$0xff]  ;;  %v301_v24 = vld [vmem:[%s3083_s1 + $0x8f0] sm:$0xff] }
  0x87   :  { %v207_v44 = vld [vmem:[%s3083_s1 + $0x600] sm:$0xff]  ;;  %1618 = vmatpush3.msra.mxu0 %v208_v39  ;;  %1653 = vmatpush3.msra.mxu1 %v240_v40  ;;  %v286_v52 = vld [vmem:[%s3083_s1 + $0x878] sm:$0xff]  ;;  %v333_v54 = vld [vmem:[%s3083_s1 + $0x9f0] sm:$0xff] }
  0x88   :  { %v239_v46 = vld [vmem:[%s3083_s1 + $0x700] sm:$0xff]  ;;  %1619 = vmatprep.subr.mxu0 %v223_v41  ;;  %1654 = vmatprep.subr.mxu1 %v255_v42  ;;  %v318_v53 = vld [vmem:[%s3083_s1 + $0x978] sm:$0xff]  ;;  %v285_v55 = vld [vmem:[%s3083_s1 + $0x870] sm:$0xff] }
  0x89   :  { %1620 = vmatpush3.msra.mxu0 %v207_v44  ;;  %1006 = vmatprep.mubr.f32.mxu0 %v457_v43  ;;  %v317_v57 = vld [vmem:[%s3083_s1 + $0x970] sm:$0xff]  ;;  %v300_v58 = vld [vmem:[%s3083_s1 + $0x8e8] sm:$0xff]  ;;  %v299_v2 = vld [vmem:[%s3083_s1 + $0x8e0] sm:$0xff] }
  0x8a   :  { %1655 = vmatpush3.msra.mxu1 %v239_v46  ;;  %1007 = vmatmul.mubr.f32.vlgmr.msra.gmra.mxu0 %v453_v45  ;;  %v332_v61 = vld [vmem:[%s3083_s1 + $0x9e8] sm:$0xff]  ;;  %v331_v3 = vld [vmem:[%s3083_s1 + $0x9e0] sm:$0xff]  ;;  %v298_v6 = vld [vmem:[%s3083_s1 + $0x8d8] sm:$0xff] }
  0x8b   :  { %1076 = vmatprep.mubr.f32.mxu1 %v465_v48  ;;  %1659 = vmatprep.subr.mxu0 %v302_v49  ;;  %v284_v62 = vld [vmem:[%s3083_s1 + $0x868] sm:$0xff]  ;;  %v283_v4 = vld [vmem:[%s3083_s1 + $0x860] sm:$0xff]  ;;  %v330_v8 = vld [vmem:[%s3083_s1 + $0x9d8] sm:$0xff] }
  0x8c   :  { %1694 = vmatprep.subr.mxu1 %v334_v51  ;;  %1077 = vmatmul.mubr.f32.vlgmr.msra.gmra.mxu1 %v461_v50  ;;  %v316_v1 = vld [vmem:[%s3083_s1 + $0x968] sm:$0xff]  ;;  %v315_v5 = vld [vmem:[%s3083_s1 + $0x960] sm:$0xff]  ;;  %v282_v9 = vld [vmem:[%s3083_s1 + $0x858] sm:$0xff] }
  0x8d   :  { %1660 = vmatpush3.msra.mxu0 %v286_v52  ;;  %1695 = vmatpush3.msra.mxu1 %v318_v53  ;;  %v314_v11 = vld [vmem:[%s3083_s1 + $0x958] sm:$0xff]  ;;  %v297_v12 = vld [vmem:[%s3083_s1 + $0x8d0] sm:$0xff]  ;;  %v296_v18 = vld [vmem:[%s3083_s1 + $0x8c8] sm:$0xff] }
  0x8e   :  { %1661 = vmatprep.subr.mxu0 %v301_v24  ;;  %1696 = vmatprep.subr.mxu1 %v333_v54  ;;  %v329_v14 = vld [vmem:[%s3083_s1 + $0x9d0] sm:$0xff]  ;;  %v328_v19 = vld [vmem:[%s3083_s1 + $0x9c8] sm:$0xff]  ;;  %v295_v21 = vld [vmem:[%s3083_s1 + $0x8c0] sm:$0xff] }
  0x8f   :  { %1662 = vmatpush3.msra.mxu0 %v285_v55  ;;  %1697 = vmatpush3.msra.mxu1 %v317_v57  ;;  %v281_v15 = vld [vmem:[%s3083_s1 + $0x850] sm:$0xff]  ;;  %v280_v47 = vld [vmem:[%s3083_s1 + $0x848] sm:$0xff]  ;;  %v327_v22 = vld [vmem:[%s3083_s1 + $0x9c0] sm:$0xff] }
  0x90   :  { %1663 = vmatprep.subr.mxu0 %v300_v58  ;;  %1698 = vmatprep.subr.mxu1 %v332_v61  ;;  %v313_v17 = vld [vmem:[%s3083_s1 + $0x950] sm:$0xff]  ;;  %v312_v20 = vld [vmem:[%s3083_s1 + $0x948] sm:$0xff]  ;;  %v279_v23 = vld [vmem:[%s3083_s1 + $0x840] sm:$0xff] }
  0x91   :  { %1664 = vmatpush3.msra.mxu0 %v284_v62  ;;  %1699 = vmatpush3.msra.mxu1 %v316_v1  ;;  %v311_v25 = vld [vmem:[%s3083_s1 + $0x940] sm:$0xff]  ;;  %v294_v26 = vld [vmem:[%s3083_s1 + $0x8b8] sm:$0xff]  ;;  %v293_v29 = vld [vmem:[%s3083_s1 + $0x8b0] sm:$0xff] }
  0x92   :  { %1665 = vmatprep.subr.mxu0 %v299_v2  ;;  %1700 = vmatprep.subr.mxu1 %v331_v3  ;;  %v326_v27 = vld [vmem:[%s3083_s1 + $0x9b8] sm:$0xff]  ;;  %v325_v30 = vld [vmem:[%s3083_s1 + $0x9b0] sm:$0xff]  ;;  %v292_v33 = vld [vmem:[%s3083_s1 + $0x8a8] sm:$0xff] }
  0x93   :  { %1666 = vmatpush3.msra.mxu0 %v283_v4  ;;  %1701 = vmatpush3.msra.mxu1 %v315_v5  ;;  %v278_v59 = vld [vmem:[%s3083_s1 + $0x838] sm:$0xff]  ;;  %v277_v31 = vld [vmem:[%s3083_s1 + $0x830] sm:$0xff]  ;;  %v324_v34 = vld [vmem:[%s3083_s1 + $0x9a8] sm:$0xff] }
  0x94   :  { %1667 = vmatprep.subr.mxu0 %v298_v6  ;;  %1702 = vmatprep.subr.mxu1 %v330_v8  ;;  %v310_v28 = vld [vmem:[%s3083_s1 + $0x938] sm:$0xff]  ;;  %v309_v32 = vld [vmem:[%s3083_s1 + $0x930] sm:$0xff]  ;;  %v276_v35 = vld [vmem:[%s3083_s1 + $0x828] sm:$0xff] }
  0x95   :  { %1668 = vmatpush3.msra.mxu0 %v282_v9  ;;  %1703 = vmatpush3.msra.mxu1 %v314_v11  ;;  %v308_v36 = vld [vmem:[%s3083_s1 + $0x928] sm:$0xff]  ;;  %v291_v37 = vld [vmem:[%s3083_s1 + $0x8a0] sm:$0xff]  ;;  %v290_v41 = vld [vmem:[%s3083_s1 + $0x898] sm:$0xff] }
  0x96   :  { %1669 = vmatprep.subr.mxu0 %v297_v12  ;;  %1704 = vmatprep.subr.mxu1 %v329_v14  ;;  %v323_v38 = vld [vmem:[%s3083_s1 + $0x9a0] sm:$0xff]  ;;  %v322_v42 = vld [vmem:[%s3083_s1 + $0x998] sm:$0xff]  ;;  %v289_v45 = vld [vmem:[%s3083_s1 + $0x890] sm:$0xff] }
  0x97   :  { %1670 = vmatpush3.msra.mxu0 %v281_v15  ;;  %1705 = vmatpush3.msra.mxu1 %v313_v17  ;;  %v275_v39 = vld [vmem:[%s3083_s1 + $0x820] sm:$0xff]  ;;  %v274_v43 = vld [vmem:[%s3083_s1 + $0x818] sm:$0xff]  ;;  %v321_v46 = vld [vmem:[%s3083_s1 + $0x990] sm:$0xff] }
  0x98   :  { %1671 = vmatprep.subr.mxu0 %v296_v18  ;;  %1706 = vmatprep.subr.mxu1 %v328_v19  ;;  %v307_v40 = vld [vmem:[%s3083_s1 + $0x920] sm:$0xff]  ;;  %v306_v44 = vld [vmem:[%s3083_s1 + $0x918] sm:$0xff]  ;;  %v273_v48 = vld [vmem:[%s3083_s1 + $0x810] sm:$0xff] }
  0x99   :  { %1672 = vmatpush3.msra.mxu0 %v280_v47  ;;  %1707 = vmatpush3.msra.mxu1 %v312_v20  ;;  %v305_v49 = vld [vmem:[%s3083_s1 + $0x910] sm:$0xff]  ;;  %v288_v51 = vld [vmem:[%s3083_s1 + $0x888] sm:$0xff]  ;;  %v287_v54 = vld [vmem:[%s3083_s1 + $0x880] sm:$0xff] }
  0x9a   :  { %1673 = vmatprep.subr.mxu0 %v295_v21  ;;  %1708 = vmatprep.subr.mxu1 %v327_v22  ;;  %v2845_v50 = vld [vmem:[%s3082_s0 + $0x10] sm:$0xff]  ;;  %v320_v52 = vld [vmem:[%s3083_s1 + $0x988] sm:$0xff]  ;;  %v319_v55 = vld [vmem:[%s3083_s1 + $0x980] sm:$0xff] }
  0x9b   :  { %1674 = vmatpush3.msra.mxu0 %v279_v23  ;;  %1709 = vmatpush3.msra.mxu1 %v311_v25  ;;  %v272_v53 = vld [vmem:[%s3083_s1 + $0x808] sm:$0xff]  ;;  %v473_v57 = vrot.slane %v2845_v50, %v2003_v56  ;;  %v271_v58 = vld [vmem:[%s3083_s1 + $0x800] sm:$0xff]  ;;  %v469_v61 = vrot.slane %v2845_v50, %v2026_v63  ;;  %v481_v1 = vrot.slane %v2845_v50, %v2017_v60  ;;  %v366_v56 = vld [vmem:[%s3083_s1 + $0xaf8] sm:$0xff] }
  0x9c   :  { %1675 = vmatprep.subr.mxu0 %v294_v26  ;;  %1710 = vmatprep.subr.mxu1 %v326_v27  ;;  %v304_v24 = vld [vmem:[%s3083_s1 + $0x908] sm:$0xff]  ;;  %v303_v62 = vld [vmem:[%s3083_s1 + $0x900] sm:$0xff]  ;;  %v477_v2 = vrot.slane %v2845_v50, %v2029_v0  ;;  %v398_v63 = vld [vmem:[%s3083_s1 + $0xbf8] sm:$0xff] }
  0x9d   :  { %1676 = vmatpush3.msra.mxu0 %v278_v59  ;;  %1711 = vmatpush3.msra.mxu1 %v310_v28  ;;  %v350_v60 = vld [vmem:[%s3083_s1 + $0xa78] sm:$0xff]  ;;  %v365_v0 = vld [vmem:[%s3083_s1 + $0xaf0] sm:$0xff]  ;;  %v364_v8 = vld [vmem:[%s3083_s1 + $0xae8] sm:$0xff] }
  0x9e   :  { %1677 = vmatprep.subr.mxu0 %v293_v29  ;;  %1712 = vmatprep.subr.mxu1 %v325_v30  ;;  %v382_v3 = vld [vmem:[%s3083_s1 + $0xb78] sm:$0xff]  ;;  %v397_v4 = vld [vmem:[%s3083_s1 + $0xbf0] sm:$0xff]  ;;  %v396_v9 = vld [vmem:[%s3083_s1 + $0xbe8] sm:$0xff] }
  0x9f   :  { %1678 = vmatpush3.msra.mxu0 %v277_v31  ;;  %1713 = vmatpush3.msra.mxu1 %v309_v32  ;;  %v349_v5 = vld [vmem:[%s3083_s1 + $0xa70] sm:$0xff]  ;;  %v348_v11 = vld [vmem:[%s3083_s1 + $0xa68] sm:$0xff]  ;;  %v363_v14 = vld [vmem:[%s3083_s1 + $0xae0] sm:$0xff] }
  0xa0   :  { %1679 = vmatprep.subr.mxu0 %v292_v33  ;;  %1714 = vmatprep.subr.mxu1 %v324_v34  ;;  %v381_v6 = vld [vmem:[%s3083_s1 + $0xb70] sm:$0xff]  ;;  %v380_v12 = vld [vmem:[%s3083_s1 + $0xb68] sm:$0xff]  ;;  %v395_v15 = vld [vmem:[%s3083_s1 + $0xbe0] sm:$0xff] }
  0xa1   :  { %1680 = vmatpush3.msra.mxu0 %v276_v35  ;;  %1715 = vmatpush3.msra.mxu1 %v308_v36  ;;  %v347_v17 = vld [vmem:[%s3083_s1 + $0xa60] sm:$0xff]  ;;  %v362_v19 = vld [vmem:[%s3083_s1 + $0xad8] sm:$0xff]  ;;  %v361_v22 = vld [vmem:[%s3083_s1 + $0xad0] sm:$0xff] }
  0xa2   :  { %1681 = vmatprep.subr.mxu0 %v291_v37  ;;  %1716 = vmatprep.subr.mxu1 %v323_v38  ;;  %v379_v18 = vld [vmem:[%s3083_s1 + $0xb60] sm:$0xff]  ;;  %v394_v47 = vld [vmem:[%s3083_s1 + $0xbd8] sm:$0xff]  ;;  %v393_v23 = vld [vmem:[%s3083_s1 + $0xbd0] sm:$0xff] }
  0xa3   :  { %1682 = vmatpush3.msra.mxu0 %v275_v39  ;;  %1717 = vmatpush3.msra.mxu1 %v307_v40  ;;  %v346_v20 = vld [vmem:[%s3083_s1 + $0xa58] sm:$0xff]  ;;  %v345_v25 = vld [vmem:[%s3083_s1 + $0xa50] sm:$0xff]  ;;  %v360_v27 = vld [vmem:[%s3083_s1 + $0xac8] sm:$0xff] }
  0xa4   :  { %1683 = vmatprep.subr.mxu0 %v290_v41  ;;  %1718 = vmatprep.subr.mxu1 %v322_v42  ;;  %v378_v21 = vld [vmem:[%s3083_s1 + $0xb58] sm:$0xff]  ;;  %v377_v26 = vld [vmem:[%s3083_s1 + $0xb50] sm:$0xff]  ;;  %v392_v59 = vld [vmem:[%s3083_s1 + $0xbc8] sm:$0xff] }
  0xa5   :  { %1684 = vmatpush3.msra.mxu0 %v274_v43  ;;  %1719 = vmatpush3.msra.mxu1 %v306_v44  ;;  %v344_v28 = vld [vmem:[%s3083_s1 + $0xa48] sm:$0xff]  ;;  %v359_v30 = vld [vmem:[%s3083_s1 + $0xac0] sm:$0xff]  ;;  %v358_v34 = vld [vmem:[%s3083_s1 + $0xab8] sm:$0xff] }
  0xa6   :  { %1685 = vmatprep.subr.mxu0 %v289_v45  ;;  %1720 = vmatprep.subr.mxu1 %v321_v46  ;;  %v376_v29 = vld [vmem:[%s3083_s1 + $0xb48] sm:$0xff]  ;;  %v391_v31 = vld [vmem:[%s3083_s1 + $0xbc0] sm:$0xff]  ;;  %v390_v35 = vld [vmem:[%s3083_s1 + $0xbb8] sm:$0xff] }
  0xa7   :  { %1686 = vmatpush3.msra.mxu0 %v273_v48  ;;  %1721 = vmatpush3.msra.mxu1 %v305_v49  ;;  %v343_v32 = vld [vmem:[%s3083_s1 + $0xa40] sm:$0xff]  ;;  %v342_v36 = vld [vmem:[%s3083_s1 + $0xa38] sm:$0xff]  ;;  %v357_v38 = vld [vmem:[%s3083_s1 + $0xab0] sm:$0xff] }
  0xa8   :  { %1687 = vmatprep.subr.mxu0 %v288_v51  ;;  %1722 = vmatprep.subr.mxu1 %v320_v52  ;;  %v375_v33 = vld [vmem:[%s3083_s1 + $0xb40] sm:$0xff]  ;;  %v374_v37 = vld [vmem:[%s3083_s1 + $0xb38] sm:$0xff]  ;;  %v389_v39 = vld [vmem:[%s3083_s1 + $0xbb0] sm:$0xff] }
  0xa9   :  { %1688 = vmatpush3.msra.mxu0 %v272_v53  ;;  %1723 = vmatpush3.msra.mxu1 %v304_v24  ;;  %v341_v40 = vld [vmem:[%s3083_s1 + $0xa30] sm:$0xff]  ;;  %v356_v42 = vld [vmem:[%s3083_s1 + $0xaa8] sm:$0xff]  ;;  %v355_v46 = vld [vmem:[%s3083_s1 + $0xaa0] sm:$0xff] }
  0xaa   :  { %1689 = vmatprep.subr.mxu0 %v287_v54  ;;  %1724 = vmatprep.subr.mxu1 %v319_v55  ;;  %v373_v41 = vld [vmem:[%s3083_s1 + $0xb30] sm:$0xff]  ;;  %v388_v43 = vld [vmem:[%s3083_s1 + $0xba8] sm:$0xff]  ;;  %v387_v48 = vld [vmem:[%s3083_s1 + $0xba0] sm:$0xff] }
  0xab   :  { %1690 = vmatpush3.msra.mxu0 %v271_v58  ;;  %1146 = vmatprep.mubr.f32.mxu0 %v473_v57  ;;  %v340_v44 = vld [vmem:[%s3083_s1 + $0xa28] sm:$0xff]  ;;  %v339_v49 = vld [vmem:[%s3083_s1 + $0xa20] sm:$0xff]  ;;  %v354_v52 = vld [vmem:[%s3083_s1 + $0xa98] sm:$0xff] }
  0xac   :  { %1725 = vmatpush3.msra.mxu1 %v303_v62  ;;  %1147 = vmatmul.mubr.f32.vlgmr.msra.gmra.mxu0 %v469_v61  ;;  %v372_v45 = vld [vmem:[%s3083_s1 + $0xb28] sm:$0xff]  ;;  %v371_v51 = vld [vmem:[%s3083_s1 + $0xb20] sm:$0xff]  ;;  %v386_v53 = vld [vmem:[%s3083_s1 + $0xb98] sm:$0xff] }
  0xad   :  { %1216 = vmatprep.mubr.f32.mxu1 %v481_v1  ;;  %1729 = vmatprep.subr.mxu0 %v366_v56  ;;  %v338_v24 = vld [vmem:[%s3083_s1 + $0xa18] sm:$0xff]  ;;  %v353_v55 = vld [vmem:[%s3083_s1 + $0xa90] sm:$0xff]  ;;  %v352_v62 = vld [vmem:[%s3083_s1 + $0xa88] sm:$0xff] }
  0xae   :  { %1764 = vmatprep.subr.mxu1 %v398_v63  ;;  %1217 = vmatmul.mubr.f32.vlgmr.msra.gmra.mxu1 %v477_v2  ;;  %v370_v54 = vld [vmem:[%s3083_s1 + $0xb18] sm:$0xff]  ;;  %v385_v57 = vld [vmem:[%s3083_s1 + $0xb90] sm:$0xff]  ;;  %v384_v1 = vld [vmem:[%s3083_s1 + $0xb88] sm:$0xff] }
  0xaf   :  { %1730 = vmatpush3.msra.mxu0 %v350_v60  ;;  %1765 = vmatpush3.msra.mxu1 %v382_v3  ;;  %v337_v58 = vld [vmem:[%s3083_s1 + $0xa10] sm:$0xff]  ;;  %v336_v56 = vld [vmem:[%s3083_s1 + $0xa08] sm:$0xff]  ;;  %v351_v63 = vld [vmem:[%s3083_s1 + $0xa80] sm:$0xff]  ;;  %v489_v3 = vrot.slane %v2845_v50, %v2220_v7  ;;  %v493_v7 = vrot.slane %v2845_v50, %v2247_v16 }
  0xb0   :  { %1731 = vmatprep.subr.mxu0 %v365_v0  ;;  %1766 = vmatprep.subr.mxu1 %v397_v4  ;;  %v369_v61 = vld [vmem:[%s3083_s1 + $0xb10] sm:$0xff]  ;;  %v368_v2 = vld [vmem:[%s3083_s1 + $0xb08] sm:$0xff]  ;;  %v383_v60 = vld [vmem:[%s3083_s1 + $0xb80] sm:$0xff]  ;;  %v497_v4 = vrot.slane %v2845_v50, %v2238_v13 }
  0xb1   :  { %1732 = vmatpush3.msra.mxu0 %v349_v5  ;;  %1767 = vmatpush3.msra.mxu1 %v381_v6  ;;  %v335_v0 = vld [vmem:[%s3083_s1 + $0xa00] sm:$0xff]  ;;  %v485_v6 = vrot.slane %v2845_v50, %v2229_v10 }
  0xb2   :  { %1733 = vmatprep.subr.mxu0 %v364_v8  ;;  %1768 = vmatprep.subr.mxu1 %v396_v9  ;;  %v367_v5 = vld [vmem:[%s3083_s1 + $0xb00] sm:$0xff]  ;;  %s1822_s1 = smov [#allocation2]  }
  0xb3   :  { %1734 = vmatpush3.msra.mxu0 %v348_v11  ;;  %1769 = vmatpush3.msra.mxu1 %v380_v12  ;;  %s1371_s22 = sshll.u32 %s1822_s1, 4  ;;  %s1372_s22 = int_to_ptr.vmem [resolvable:$true] %s1371_s22 }
  0xb4   :  { %1735 = vmatprep.subr.mxu0 %v363_v14  ;;  %1770 = vmatprep.subr.mxu1 %v395_v15  ;;  %s1800_s23 = scalar_lea.vmem %s1372_s22, 16  ;;  %s1804_s24 = scalar_lea.vmem %s1372_s22, 32 }
  0xb5   :  { %1736 = vmatpush3.msra.mxu0 %v347_v17  ;;  %1771 = vmatpush3.msra.mxu1 %v379_v18  ;;  %p1801_p0 = scmp.ne.s32.totalorder %s1372_s22, %s1800_s23  ;;  %p1805_p1 = scmp.lt.s32.totalorder %s1372_s22, %s1372_s22 }
  0xb6   :  { %1737 = vmatprep.subr.mxu0 %v362_v19  ;;  %1772 = vmatprep.subr.mxu1 %v394_v47  ;;  %p1806_p2 = scmp.lt.s32.totalorder %s1804_s24, %s1800_s23 }
  0xb7   :  { %1738 = vmatpush3.msra.mxu0 %v346_v20  ;;  %1773 = vmatpush3.msra.mxu1 %v378_v21 }
  0xb8   :  { %1739 = vmatprep.subr.mxu0 %v361_v22  ;;  %1774 = vmatprep.subr.mxu1 %v393_v23  ;;  %p1807_p3 = por %p1806_p2, %p1805_p1 }
  0xb9   :  { %1740 = vmatpush3.msra.mxu0 %v345_v25  ;;  %1775 = vmatpush3.msra.mxu1 %v377_v26 }
  0xba   :  { %1741 = vmatprep.subr.mxu0 %v360_v27  ;;  %1776 = vmatprep.subr.mxu1 %v392_v59  ;;  %p1808_p4 = pnand %p1807_p3, %p1801_p0 }
  0xbb   :  { %1742 = vmatpush3.msra.mxu0 %v344_v28  ;;  %1777 = vmatpush3.msra.mxu1 %v376_v29 }
  0xbc   :  { %1743 = vmatprep.subr.mxu0 %v359_v30  ;;  %1778 = vmatprep.subr.mxu1 %v391_v31 }
  0xbd   :  { %1744 = vmatpush3.msra.mxu0 %v343_v32  ;;  %1779 = vmatpush3.msra.mxu1 %v375_v33 }
  0xbe   :  { %1745 = vmatprep.subr.mxu0 %v358_v34  ;;  %1780 = vmatprep.subr.mxu1 %v390_v35 }
  0xbf   :  { %1746 = vmatpush3.msra.mxu0 %v342_v36  ;;  %1781 = vmatpush3.msra.mxu1 %v374_v37 }
  0xc0   :  { %1747 = vmatprep.subr.mxu0 %v357_v38  ;;  %1782 = vmatprep.subr.mxu1 %v389_v39 }
  0xc1   :  { %1748 = vmatpush3.msra.mxu0 %v341_v40  ;;  %1783 = vmatpush3.msra.mxu1 %v373_v41 }
  0xc2   :  { %1749 = vmatprep.subr.mxu0 %v356_v42  ;;  %1784 = vmatprep.subr.mxu1 %v388_v43 }
  0xc3   :  { %1750 = vmatpush3.msra.mxu0 %v340_v44  ;;  %1785 = vmatpush3.msra.mxu1 %v372_v45 }
  0xc4   :  { %1751 = vmatprep.subr.mxu0 %v355_v46  ;;  %1786 = vmatprep.subr.mxu1 %v387_v48 }
  0xc5   :  { %1752 = vmatpush3.msra.mxu0 %v339_v49  ;;  %1787 = vmatpush3.msra.mxu1 %v371_v51 }
  0xc6   :  { %1753 = vmatprep.subr.mxu0 %v354_v52  ;;  %1788 = vmatprep.subr.mxu1 %v386_v53 }
  0xc7   :  { %1754 = vmatpush3.msra.mxu0 %v338_v24  ;;  %1789 = vmatpush3.msra.mxu1 %v370_v54 }
  0xc8   :  { %1755 = vmatprep.subr.mxu0 %v353_v55  ;;  %1790 = vmatprep.subr.mxu1 %v385_v57 }
  0xc9   :  { %1756 = vmatpush3.msra.mxu0 %v337_v58  ;;  %1791 = vmatpush3.msra.mxu1 %v369_v61 }
  0xca   :  { %1757 = vmatprep.subr.mxu0 %v352_v62  ;;  %1792 = vmatprep.subr.mxu1 %v384_v1 }
  0xcb   :  { %1758 = vmatpush3.msra.mxu0 %v336_v56  ;;  %1793 = vmatpush3.msra.mxu1 %v368_v2 }
  0xcc   :  { %1759 = vmatprep.subr.mxu0 %v351_v63  ;;  %1794 = vmatprep.subr.mxu1 %v383_v60 }
  0xcd   :  { %1760 = vmatpush3.msra.mxu0 %v335_v0  ;;  %1286 = vmatprep.mubr.f32.mxu0 %v489_v3 }
  0xce   :  { %1795 = vmatpush3.msra.mxu1 %v367_v5  ;;  %1356 = vmatprep.mubr.f32.mxu1 %v497_v4 }
  0xcf   :  { %1287 = vmatmul.mubr.f32.vlgmr.msra.gmra.mxu0 %v485_v6  ;;  %1357 = vmatmul.mubr.f32.vlgmr.msra.gmra.mxu1 %v493_v7 }
  0xe4   :  { %v1411_v13 = vpop.f32.mrf.mxu0 }
  0xe5   :  { %v1446_v8 = vpop.f32.mrf.mxu1 }
  0xe6   :  { %v1412_v9 = vpop.f32.mrf.mxu0 }
  0xe7   :  { %v1447_v12 = vpop.f32.mrf.mxu1  ;;  %v1413_v17 = vadd.f32 %v1412_v9, %v1411_v13 }
  0xe8   :  { %v1448_v10 = vadd.f32 %v1447_v12, %v1446_v8 }
  0xea   :  { %v659_v50 = vadd.f32 %v1448_v10, %v1413_v17 }
 0x106   :  { %v1481_v11 = vpop.f32.mrf.mxu0 }
 0x108   :  { %v1516_v14 = vpop.f32.mrf.mxu1  ;;  %v1482_v15 = vpop.f32.mrf.mxu0 }
 0x109   :  { %v1483_v19 = vadd.f32 %v1482_v15, %v1481_v11 }
 0x10a   :  { %v1517_v16 = vpop.f32.mrf.mxu1 }
 0x10b   :  { %v729_v21 = vadd.f32 %v1483_v19, %v659_v50  ;;  %v1518_v22 = vadd.f32 %v1517_v16, %v1516_v14 }
 0x10d   :  { %v799_v27 = vadd.f32 %v1518_v22, %v729_v21 }
 0x128   :  { %v1551_v18 = vpop.f32.mrf.mxu0 }
 0x12a   :  { %v1586_v47 = vpop.f32.mrf.mxu1  ;;  %v1552_v20 = vpop.f32.mrf.mxu0 }
 0x12b   :  { %v1553_v25 = vadd.f32 %v1552_v20, %v1551_v18 }
 0x12c   :  { %v1587_v26 = vpop.f32.mrf.mxu1 }
 0x12d   :  { %v869_v29 = vadd.f32 %v1553_v25, %v799_v27  ;;  %v1588_v30 = vadd.f32 %v1587_v26, %v1586_v47 }
 0x12f   :  { %v939_v34 = vadd.f32 %v1588_v30, %v869_v29 }
 0x14a   :  { %v1621_v23 = vpop.f32.mrf.mxu0 }
 0x14c   :  { %v1656_v59 = vpop.f32.mrf.mxu1  ;;  %v1622_v28 = vpop.f32.mrf.mxu0 }
 0x14d   :  { %v1623_v32 = vadd.f32 %v1622_v28, %v1621_v23 }
 0x14e   :  { %v1657_v33 = vpop.f32.mrf.mxu1 }
 0x14f   :  { %v1009_v37 = vadd.f32 %v1623_v32, %v939_v34  ;;  %v1658_v38 = vadd.f32 %v1657_v33, %v1656_v59 }
 0x151   :  { %v1079_v41 = vadd.f32 %v1658_v38, %v1009_v37 }
 0x16c   :  { %v1691_v31 = vpop.f32.mrf.mxu0 }
 0x16e   :  { %v1726_v35 = vpop.f32.mrf.mxu1  ;;  %v1692_v36 = vpop.f32.mrf.mxu0 }
 0x16f   :  { %v1693_v39 = vadd.f32 %v1692_v36, %v1691_v31 }
 0x170   :  { %v1727_v40 = vpop.f32.mrf.mxu1 }
 0x171   :  { %v1149_v42 = vadd.f32 %v1693_v39, %v1079_v41  ;;  %v1728_v43 = vadd.f32 %v1727_v40, %v1726_v35 }
 0x173   :  { %v1219_v49 = vadd.f32 %v1728_v43, %v1149_v42 }
 0x18f   :  { %v1761_v44 = vpop.f32.mrf.mxu0  ;;  %v1796_v45 = vpop.f32.mrf.mxu1 }
 0x191   :  { %v1762_v46 = vpop.f32.mrf.mxu0  ;;  %v1797_v48 = vpop.f32.mrf.mxu1 }
 0x192   :  { %v1763_v51 = vadd.f32 %v1762_v46, %v1761_v44  ;;  %v1798_v53 = vadd.f32 %v1797_v48, %v1796_v45 }
 0x194   :  { %v1289_v52 = vadd.f32 %v1763_v51, %v1219_v49 }
 0x196   :  { %v1359_v24 = vadd.f32 %v1798_v53, %v1289_v52 }
 0x198   :  { %v1362_v54 = vmax.f32 %v1359_v24, 0.0 }
 0x19a   :  { %1364 = vst.msk [vmem:[#allocation2] sm:$0x1] %vm1363_vm0, %v1362_v54 }
 0x19b   :  { %1811 = shalt.err (!%p1808_p4)
}
 0x19c   :  { %1374 = dma.vmem_to_hbm [thread:$0]  %s1372_s22, 16, %s3084_s2, [#allocation3]  }
 0x19d   :  { %1820 = dma.done.wait [#allocation3], 16  }
 0x19e   :  { %1821 = vsyncadd [#allocation3], 4294967280 }
 0x19f   :  { %1378 = vsyncpa [#allocation3], 1 }

</bundles_post_ra>
